<compile_context>
chip_gen: v7x
topology: tpu7x:2x2x1
jax: 0.10.0
libtpu: 0.0.40
codegen_flags: <defaults>
</compile_context>

<pallas_src>
import functools

import jax
import jax.numpy as jnp
from jax.experimental import pallas as pl
from jax.experimental.pallas import tpu as pltpu


def _round_up(x, m):
    return (x + m - 1) // m * m


def _align(d):
    # 256-align large matmul dims for the 2x256x256 MXU (v6e/v7x); keep small
    # dims at 128 so zero-pad FLOPs don't dominate.  v5e (4x128^2) is fine with
    # either.
    return _round_up(d, 256 if d >= 512 else 128)


def hybrid_embed_kernel(p_ref, w1_ref, w2_ref, b_ref, o_ref):
    # Backbone conv as a matmul over im2col patch rows (MXU, bf16 operands,
    # f32 accumulation).  The conv bias has been folded into b_ref on the
    # host, so no (TM, Fp) broadcast-add is needed here.
    feat = jnp.dot(p_ref[...], w1_ref[...], preferred_element_type=jnp.float32)
    # self.proj Linear (bf16 operands into f32 accumulator) + folded bias (f32).
    out = jnp.dot(feat.astype(w2_ref.dtype), w2_ref[...],
                  preferred_element_type=jnp.float32) + b_ref[...]
    o_ref[...] = out.astype(o_ref.dtype)


@functools.partial(jax.jit, static_argnames=("patch", "tm", "out_dtype"))
def hybrid_embed(x_nchw, w_conv, b_conv, w_proj, b_proj, *, patch=4, tm=256,
                 out_dtype=jnp.bfloat16):
    """x_nchw: [B, C, H, W] -> [B, N, embed_dim] with N = (H/patch)*(W/patch).

    tm: row-tile size.  256 fits every chip; sweep 512 on v6e/v5e once the
    VMEM budget allows (better HBM streaming efficiency), keep 256 on v7x
    (64 MiB VMEM).
    """
    B, C, H, W = x_nchw.shape
    Hf, Wf = H // patch, W // patch
    N = Hf * Wf
    M = B * N
    K1 = C * patch * patch
    F = w_conv.shape[1]
    E = w_proj.shape[1]

    # PyTorch-style 1-D biases are accepted; normalize to (1, dim).
    b_conv = jnp.asarray(b_conv).reshape(1, F)
    b_proj = jnp.asarray(b_proj).reshape(1, E)

    # Lane-dense (and MXU-fill-friendly) padded sizes.
    K1p = _round_up(K1, 128)
    Fp = _align(F)
    Ep = _align(E)

    # Row tile: multiple of 16 (bf16 sublane packing), capped so the
    # 'parallel' M axis has >= 2 tiles whenever M allows (v7x megacore).
    TM = min(tm, max(16, _round_up(-(-M // 2), 16)))
    Mp = _round_up(M, TM)

    # im2col (glue): NCHW -> [M, K1].  Under jit, the transpose / pad / bf16
    # cast fuse into one HBM pass producing the operand the kernel streams.
    # TODO(synk): the real HybridEmbed backbone is an arbitrary nn.Module; a
    # strided conv (kernel=stride=patch) stands in for it here, lowered to an
    # im2col matmul.  A non-conv backbone would run as its own XLA computation
    # and feed its [B, F, Hf, Wf] feature map in directly.
    p = x_nchw.reshape(B, C, Hf, patch, Wf, patch)
    p = p.transpose(0, 2, 4, 1, 3, 5).reshape(M, K1)
    if Mp != M or K1p != K1:
        p = jnp.pad(p, ((0, Mp - M), (0, K1p - K1)))
    p = p.astype(jnp.bfloat16)

    w1 = w_conv
    if K1p != K1 or Fp != F:
        w1 = jnp.pad(w1, ((0, K1p - K1), (0, Fp - F)))
    w1 = w1.astype(jnp.bfloat16)

    w2 = w_proj
    if Fp != F or Ep != E:
        w2 = jnp.pad(w2, ((0, Fp - F), (0, Ep - E)))
    w2 = w2.astype(jnp.bfloat16)

    # Fold the conv bias into the proj bias on the host (f32, exact):
    #   (p @ w1 + b1) @ w2 + b2 == p @ w1 @ w2 + (b1 @ w2 + b2)
    b_eff = (b_conv.astype(jnp.float32) @ w_proj.astype(jnp.float32)
             + b_proj.astype(jnp.float32))
    if Ep != E:
        b_eff = jnp.pad(b_eff, ((0, 0), (0, Ep - E)))

    out_itemsize = jnp.dtype(out_dtype).itemsize

    # VMEM budget: single-buffered resident weights/bias, double-buffered
    # streamed row tile + output tile, plus the (TM, Fp) f32 feat intermediate
    # the compiler keeps in vregs / internal scratch.
    residency = (K1p * Fp * 2                     # w1 (bf16, Buffered(1))
                 + Fp * Ep * 2                    # w2 (bf16, Buffered(1))
                 + 8 * Ep * 4                     # folded bias (f32, sublane-padded)
                 + 2 * TM * K1p * 2               # p row tile (bf16, double-buffered)
                 + 2 * TM * Ep * out_itemsize     # output tile (double-buffered)
                 + TM * Fp * 4)                   # feat intermediate (f32)
    vmem_limit = min(64 << 20, max(16 << 20, (residency * 3) // 2 + (2 << 20)))

    cost = pl.CostEstimate(
        flops=2 * Mp * (K1p * Fp + Fp * Ep),
        transcendentals=0,
        bytes_accessed=(Mp * K1p * 2 + K1p * Fp * 2 + Fp * Ep * 2
                        + Ep * 4 + Mp * Ep * out_itemsize),
    )

    out = pl.pallas_call(
        hybrid_embed_kernel,
        out_shape=jax.ShapeDtypeStruct((Mp, Ep), out_dtype),
        grid_spec=pl.GridSpec(
            grid=(Mp // TM,),
            in_specs=[
                # Streamed patch row-tile (default double-buffered pipeline).
                pl.BlockSpec((TM, K1p), lambda i: (i, 0)),
                # Resident operands: constant index_map -> single buffer.
                pl.BlockSpec((K1p, Fp), lambda i: (0, 0),
                             pipeline_mode=pl.Buffered(1)),
                pl.BlockSpec((Fp, Ep), lambda i: (0, 0),
                             pipeline_mode=pl.Buffered(1)),
                pl.BlockSpec((1, Ep), lambda i: (0, 0),
                             pipeline_mode=pl.Buffered(1)),
            ],
            out_specs=pl.BlockSpec((TM, Ep), lambda i: (i, 0)),
        ),
        compiler_params=pltpu.CompilerParams(
            dimension_semantics=("parallel",),      # megacore sharding on v7x
            vmem_limit_bytes=int(vmem_limit)),
        cost_estimate=cost,
    )(p, w1, w2, b_eff)

    # Strip padding (no-op when already aligned) and restore [B, N, E]
    # = flatten(2).transpose(1, 2) -> proj.
    if Mp != M or Ep != E:
        out = out[:M, :E]
    return out.reshape(B, N, E)


if __name__ == "__main__":
    # Small shapes consistent with the module's forward:
    #   batch=2, in_chans=4, img 16x16, backbone downsample 4x -> feature 4x4,
    #   feature_dim=32, embed_dim=48 -> output [2, 16, 48].
    B, C, H, W = 2, 4, 16, 16
    PATCH = 4
    FEATURE_DIM = 32
    EMBED_DIM = 48

    key = jax.random.PRNGKey(0)
    kx, k1, k2, k3, k4 = jax.random.split(key, 5)

    x = jax.random.normal(kx, (B, C, H, W), dtype=jnp.float32)

    # Synthetic deterministic backbone params: Conv2d(C, FEATURE_DIM, 4, stride=4)
    # expressed as an im2col weight [C*4*4, FEATURE_DIM].  Biases are 1-D,
    # matching PyTorch Conv2d / Linear.
    K1 = C * PATCH * PATCH
    w_conv = jax.random.normal(k1, (K1, FEATURE_DIM), dtype=jnp.float32) * 0.05
    b_conv = jax.random.normal(k2, (FEATURE_DIM,), dtype=jnp.float32) * 0.01

    # self.proj = nn.Linear(feature_dim, embed_dim)
    w_proj = jax.random.normal(k3, (FEATURE_DIM, EMBED_DIM), dtype=jnp.float32) * 0.05
    b_proj = jax.random.normal(k4, (EMBED_DIM,), dtype=jnp.float32) * 0.01

    # tm=16 exercises the tiled / pipelined / multi-step-grid path even at
    # this tiny M (=32).
    out = hybrid_embed(x, w_conv, b_conv, w_proj, b_proj, patch=PATCH, tm=16)
    out = jax.block_until_ready(out)

    # Pure-JAX f32 reference of the same semantics.
    Hf, Wf = H // PATCH, W // PATCH
    p_ref = x.reshape(B, C, Hf, PATCH, Wf, PATCH).transpose(0, 2, 4, 1, 3, 5)
    p_ref = p_ref.reshape(B * Hf * Wf, K1)
    feat_ref = p_ref @ w_conv + b_conv[None, :]          # backbone feature [M, F]
    ref = (feat_ref @ w_proj + b_proj[None, :]).reshape(B, Hf * Wf, EMBED_DIM)

    assert out.shape == (B, Hf * Wf, EMBED_DIM), out.shape
    assert out.dtype == jnp.bfloat16, out.dtype
    # bf16 matmul operands / bf16 output with f32 accumulation -> relaxed tol.
    err = float(jnp.max(jnp.abs(out.astype(jnp.float32) - ref)))
    assert err < 2e-2, "mismatch vs reference, max |diff| = %e" % err
    print("KERNEL_OK")
</pallas_src>

<mosaic_0001>
module attributes {stable_mosaic.version = 11 : i64} {
  func.func @hybrid_embed_kernel(%arg0: i32, %arg1: memref<16x128xbf16, #tpu.memory_space<vmem>>, %arg2: memref<128x128xbf16, #tpu.memory_space<vmem>>, %arg3: memref<128x128xbf16, #tpu.memory_space<vmem>>, %arg4: memref<1x128xf32, #tpu.memory_space<vmem>>, %arg5: memref<16x128xbf16, #tpu.memory_space<vmem>>) attributes {dimension_semantics = [#tpu.dimension_semantics<parallel>], iteration_bounds = array<i64: 2>, scalar_prefetch = 0 : i64, scratch_operands = 0 : i64, tpu.core_type = #tpu.core_type<tc>, window_params = [{transform_indices = @transform_0, window_bounds = array<i64: 16, 128>}, {pipeline_mode = #tpu.pipeline_mode<synchronous>, transform_indices = @transform_1, window_bounds = array<i64: 128, 128>}, {pipeline_mode = #tpu.pipeline_mode<synchronous>, transform_indices = @transform_2, window_bounds = array<i64: 128, 128>}, {pipeline_mode = #tpu.pipeline_mode<synchronous>, transform_indices = @transform_3, window_bounds = array<i64: 1, 128>}, {transform_indices = @transform_4, window_bounds = array<i64: 16, 128>}]} {
    %c0 = arith.constant 0 : index
    %c0_0 = arith.constant 0 : index
    %0 = vector.load %arg1[%c0, %c0_0] : memref<16x128xbf16, #tpu.memory_space<vmem>>, vector<16x128xbf16>
    %c0_1 = arith.constant 0 : index
    %c0_2 = arith.constant 0 : index
    %1 = vector.load %arg2[%c0_1, %c0_2] : memref<128x128xbf16, #tpu.memory_space<vmem>>, vector<128x128xbf16>
    %cst = arith.constant dense<0.000000e+00> : vector<16x128xf32>
    %2 = tpu.matmul %0, %1, %cst {dimension_numbers = #tpu.dot_dimension_numbers<[1], [0], [0], [1], [0, 0, 1, 1], [], []>} : vector<16x128xbf16>, vector<128x128xbf16>, vector<16x128xf32> -> vector<16x128xf32>
    %3 = arith.truncf %2 : vector<16x128xf32> to vector<16x128xbf16>
    %c0_3 = arith.constant 0 : index
    %c0_4 = arith.constant 0 : index
    %4 = vector.load %arg3[%c0_3, %c0_4] : memref<128x128xbf16, #tpu.memory_space<vmem>>, vector<128x128xbf16>
    %cst_5 = arith.constant dense<0.000000e+00> : vector<16x128xf32>
    %5 = tpu.matmul %3, %4, %cst_5 {dimension_numbers = #tpu.dot_dimension_numbers<[1], [0], [0], [1], [0, 0, 1, 1], [], []>} : vector<16x128xbf16>, vector<128x128xbf16>, vector<16x128xf32> -> vector<16x128xf32>
    %c0_6 = arith.constant 0 : index
    %c0_7 = arith.constant 0 : index
    %6 = vector.load %arg4[%c0_6, %c0_7] : memref<1x128xf32, #tpu.memory_space<vmem>>, vector<1x128xf32>
    %7 = vector.broadcast %6 : vector<1x128xf32> to vector<16x128xf32>
    %8 = arith.addf %5, %7 : vector<16x128xf32>
    %9 = arith.truncf %8 : vector<16x128xf32> to vector<16x128xbf16>
    %c0_8 = arith.constant 0 : index
    %c0_9 = arith.constant 0 : index
    %10 = vector.load %arg5[%c0_8, %c0_9] : memref<16x128xbf16, #tpu.memory_space<vmem>>, vector<16x128xbf16>
    tpu.vector_store %arg5[%c0_8, %c0_9], %9 {strides = array<i32>} : memref<16x128xbf16, #tpu.memory_space<vmem>>, vector<16x128xbf16>,
    return
  }
  func.func @transform_0(%arg0: i32) -> (i32, i32) {
    %c0_i32 = arith.constant 0 : i32
    %c0_i32_0 = arith.constant 0 : i32
    return %arg0, %c0_i32 : i32, i32
  }
  func.func @transform_1(%arg0: i32) -> (i32, i32) {
    %c0_i32 = arith.constant 0 : i32
    %c0_i32_0 = arith.constant 0 : i32
    %c0_i32_1 = arith.constant 0 : i32
    return %c0_i32, %c0_i32_0 : i32, i32
  }
  func.func @transform_2(%arg0: i32) -> (i32, i32) {
    %c0_i32 = arith.constant 0 : i32
    %c0_i32_0 = arith.constant 0 : i32
    %c0_i32_1 = arith.constant 0 : i32
    return %c0_i32, %c0_i32_0 : i32, i32
  }
  func.func @transform_3(%arg0: i32) -> (i32, i32) {
    %c0_i32 = arith.constant 0 : i32
    %c0_i32_0 = arith.constant 0 : i32
    %c0_i32_1 = arith.constant 0 : i32
    return %c0_i32, %c0_i32_0 : i32, i32
  }
  func.func @transform_4(%arg0: i32) -> (i32, i32) {
    %c0_i32 = arith.constant 0 : i32
    %c0_i32_0 = arith.constant 0 : i32
    return %arg0, %c0_i32 : i32, i32
  }
}

</mosaic_0001>

<bundles_post_ra>
// kernel: hybrid_embed.1
= control target key start
LH: loop header
LB: loop body
LE: loop exit
PB: predicated region body
PF: predicated region fallthrough
CT: control target
= control target key end

     0   :  { %9 = vsyncpa [#allocation3], 0  ;;  %s920_s0 = inlined_call_operand.vmem [shape: bf16[32,128], index: 0, kind: input, shape index: {}]   ;;  %s921_s1 = inlined_call_operand.vmem [shape: bf16[128,128], index: 1, kind: input, shape index: {}]   ;;  %s922_s2 = inlined_call_operand.vmem [shape: bf16[128,128], index: 2, kind: input, shape index: {}]   ;;  %s923_s3 = inlined_call_operand.vmem [shape: f32[1,128], index: 3, kind: input, shape index: {}]   ;;  %s924_s4 = inlined_call_operand.hbm [shape: bf16[32,128], index: 4, kind: output, shape index: {}]  }
   0x1   :  { %11 = vsyncpa [#allocation3 + $0x1], 0  ;;  %s764_s15 = smov 0   ;;  %s766_s16 = smov 0  }
   0x2   :  { %s768_s17 = smov 0   ;;  %s770_s18 = smov 0  }
   0x3 LB: > { %s785_s19 = sadd.s32 4294967295, %s732_s18   ;;  %s512_s20 = sadd.s32 4294967294, %s732_s18   ;;  %s732_s18 = sphi %s770_s18, %s930_s18   ;;  %s728_s17 = sphi %s768_s17, %s929_s17   ;;  %s724_s16 = sphi %s766_s16, %s928_s16   ;;  %s720_s15 = sphi %s764_s15, %s927_s15  }
   0x4   : > { %s789_s21 = sadd.s32 1, %s732_s18   ;;  %s113_s22 = sadd.s32 1, %s728_s17 }
   0x5   : > { %s110_s23 = ssub.s32 %s732_s18, %s789_s21  ;;  %p123_p0 = scmp.ne.s32.totalorder %s728_s17, %s724_s16 }
   0x6   : > { %p111_p1 = scmp.eq.s32.totalorder %s110_s23, 0  ;;  %p124_p2 = scmp.eq.s32.totalorder %s785_s19, 1 }
   0x7   : > { %p129_p3 = scmp.ne.s32.totalorder %s724_s16, %s720_s15  ;;  %p130_p4 = scmp.eq.s32.totalorder %s512_s20, 1 }
   0x8   : > { %s800_s24 = scalar_select %p111_p1, %s728_s17, %s113_s22  }
   0x9   : > { %p802_p5 = por %p124_p2, %p123_p0  ;;  %p806_p6 = por %p130_p4, %p129_p3 }
   0xa   : > { %p515_p7 = scmp.ge.s32.totalorder %s732_s18, 1  ;;  %p166_p8 = scmp.lt.s32.totalorder %s732_s18, 3 }
   0xc   : > { %p167_p9 = pnand %p515_p7, %p166_p8 }
   0xd   : > { %v653_v0 = vld [vmem:[%s921_s1] sm:$0xff] (!%p167_p9)   ;;  %v734_v1 = vmov (!%p167_p9), 0.0   ;;  %v654_v2 = vld [vmem:[%s921_s1 + $0x8] sm:$0xff] (!%p167_p9)   ;;  %vm735_vm0 = vmmov (!%p167_p9), 0   ;;  %s517_s5 = sshll.u32 (!%p167_p9), %s785_s19, 1  ;;  %v655_v3 = vld [vmem:[%s921_s1 + $0x10] sm:$0xff] (!%p167_p9)  }
   0xe   : > { %170 = sbr.rel (%p167_p9) target bundleno = 495 (0x1ef), region = 36  ;;  %570 = vmatprep.subr.bf16.mxu0 (!%p167_p9), %v734_v1  ;;  %590 = vmatprep.subr.bf16.mxu1 (!%p167_p9), %v734_v1  ;;  %p193_p10 = scmp.lt.s32.totalorder (!%p167_p9), %s517_s5, 3  ;;  %v662_v4 = vld [vmem:[%s922_s2] sm:$0xff] (!%p167_p9)   ;;  %v656_v5 = vld [vmem:[%s921_s1 + $0x18] sm:$0xff] (!%p167_p9)   ;;  %v663_v6 = vld [vmem:[%s922_s2 + $0x8] sm:$0xff] (!%p167_p9)  }
   0xf   : > { %571 = vmatpush3.bf16.msra.mxu0 (!%p167_p9), %v653_v0  ;;  %586 = vmatprep.mubr.msk.bf16.mxu0 (!%p167_p9), %vm735_vm0, %v734_v1  ;;  %v657_v7 = vld [vmem:[%s921_s1 + $0x20] sm:$0xff] (!%p167_p9)   ;;  %v664_v8 = vld [vmem:[%s922_s2 + $0x10] sm:$0xff] (!%p167_p9)   ;;  %v658_v9 = vld [vmem:[%s921_s1 + $0x28] sm:$0xff] (!%p167_p9)   ;;  %s546_s10 = sshll.u32 (!%p167_p9), %s785_s19, 7  ;;  %s736_s19 = smov (!%p167_p9), [#allocation2]  }
  0x10   : > { %572 = vmatprep.subr.bf16.mxu0 (!%p167_p9), %v734_v1  ;;  %606 = vmatprep.mubr.msk.bf16.mxu1 (!%p167_p9), %vm735_vm0, %v734_v1  ;;  %v665_v10 = vld [vmem:[%s922_s2 + $0x18] sm:$0xff] (!%p167_p9)   ;;  %v659_v11 = vld [vmem:[%s921_s1 + $0x30] sm:$0xff] (!%p167_p9)   ;;  %v666_v12 = vld [vmem:[%s922_s2 + $0x20] sm:$0xff] (!%p167_p9)   ;;  %s877_s14 = scalar_lea.hbm (!%p167_p9), %s924_s4, %s546_s10  ;;  %s674_s23 = sshll.u32 (!%p167_p9), %s736_s19, 4  ;;  %s675_s23 = int_to_ptr.vmem [resolvable:$false] %s674_s23 }
  0x11   : > { %591 = vmatpush3.bf16.msra.mxu1 (!%p167_p9), %v662_v4  ;;  %v660_v13 = vld [vmem:[%s921_s1 + $0x38] sm:$0xff] (!%p167_p9)   ;;  %v667_v14 = vld [vmem:[%s922_s2 + $0x28] sm:$0xff] (!%p167_p9)   ;;  %v668_v16 = vld [vmem:[%s922_s2 + $0x30] sm:$0xff] (!%p167_p9)   ;;  %s676_s27 = scalar_lea.vmem (!%p167_p9), %s675_s23, 256 }
  0x12   : > { %592 = vmatprep.subr.bf16.mxu1 (!%p167_p9), %v734_v1  ;;  %v669_v17 = vld [vmem:[%s922_s2 + $0x38] sm:$0xff] (!%p167_p9)   ;;  %v528_v23 = vld [vmem:[%s923_s3] ss:$0 sm:$0xff] (!%p167_p9) }
  0x13   : > { %573 = vmatpush3.bf16.msra.mxu0 (!%p167_p9), %v654_v2 }
  0x14   : > { %574 = vmatprep.subr.bf16.mxu0 (!%p167_p9), %v734_v1 }
  0x15   : > { %s932_s5 = smov (!%p193_p10, %s517_s5), 3  ;;  %593 = vmatpush3.bf16.msra.mxu1 %v663_v6 }
  0x16   : > { %s518_s8 = sshll.u32 %s932_s5, 2  ;;  %594 = vmatprep.subr.bf16.mxu1 %v734_v1 }
  0x17   : > { %s825_s11 = scalar_lea.vmem %s920_s0, %s518_s8  ;;  %575 = vmatpush3.bf16.msra.mxu0 %v655_v3 }
  0x18   : > { %576 = vmatprep.subr.bf16.mxu0 %v734_v1  ;;  %v661_v15 = vld [vmem:[%s825_s11] sm:$0xff]   ;;  %s189_s11 = sand.u32 1, %s724_s16  }
  0x19   : > { %595 = vmatpush3.bf16.msra.mxu1 %v664_v8  ;;  %s516_s5 = sshll.u32 %s189_s11, 3  ;;  %s879_s20 = scalar_lea.sflag [#allocation3], %s189_s11 }
  0x1a   : > { %596 = vmatprep.subr.bf16.mxu1 %v734_v1  ;;  %s191_s8 = scalar_lea.vmem [#allocation2], %s516_s5 }
  0x1b   : > { %577 = vmatpush3.bf16.msra.mxu0 %v656_v5  ;;  %s450_s9 = sshll.u32 %s191_s8, 4  ;;  %s872_s9 = int_to_ptr.vmem [resolvable:$true] %s450_s9 }
  0x1c   : > { %578 = vmatprep.subr.bf16.mxu0 %v734_v1  ;;  %s670_s22 = scalar_lea.vmem %s872_s9, 128  ;;  %p677_p0 = scmp.lt.s32.totalorder %s872_s9, %s675_s23 }
  0x1d   : > { %597 = vmatpush3.bf16.msra.mxu1 %v665_v10  ;;  %p671_p11 = scmp.ne.s32.totalorder %s872_s9, %s670_s22  ;;  %p678_p1 = scmp.lt.s32.totalorder %s676_s27, %s670_s22 }
  0x1e   : > { %598 = vmatprep.subr.bf16.mxu1 %v734_v1 }
  0x1f   : > { %579 = vmatpush3.bf16.msra.mxu0 %v657_v7  ;;  %p672_p12 = pnand %p671_p11, %p802_p5  ;;  %p679_p2 = por %p678_p1, %p677_p0 }
  0x20   : > { %580 = vmatprep.subr.bf16.mxu0 %v734_v1 }
  0x21   : > { %599 = vmatpush3.bf16.msra.mxu1 %v666_v12  ;;  %p673_p13 = pneg %p672_p12 }
  0x22   : > { %600 = vmatprep.subr.bf16.mxu1 %v734_v1 }
  0x23   : > { %581 = vmatpush3.bf16.msra.mxu0 %v658_v9  ;;  %p680_p3 = pnand %p679_p2, %p673_p13 }
  0x24   : > { %582 = vmatprep.subr.bf16.mxu0 %v734_v1 }
  0x25   : > { %601 = vmatpush3.bf16.msra.mxu1 %v667_v14 }
  0x26   : > { %602 = vmatprep.subr.bf16.mxu1 %v734_v1 }
  0x27   : > { %583 = vmatpush3.bf16.msra.mxu0 %v659_v11 }
  0x28   : > { %584 = vmatprep.subr.bf16.mxu0 %v734_v1 }
  0x29   : > { %603 = vmatpush3.bf16.msra.mxu1 %v668_v16 }
  0x2a   : > { %604 = vmatprep.subr.bf16.mxu1 %v734_v1 }
  0x2b   : > { %585 = vmatpush3.bf16.msra.mxu0 %v660_v13 }
  0x2d   : > { %605 = vmatpush3.bf16.msra.mxu1 %v669_v17 }
  0x2e   : > { %587 = vmatmul.mubr.bf16.vlgmr.msra.gmra.mrb[0].mxu0 %v661_v15 }
 0x101   : > { %v306_v18 = vpop.f32.mrb[0].mxu0 }
 0x102   : > { %v588_v19 = vpop.f32.mrb[1].mxu0 }
 0x103   : > { %v309_v20 = vpop.f32.mrb[2].mxu0 }
 0x104   : > { %v313_v21 = vpack.c.bf16 %v309_v20, %v306_v18  ;;  %v589_v22 = vpop.f32.mrb[3].mxu0 }
 0x106   : > { %607 = vmatmul.mubr.bf16.vlgmr.msra.gmra.mrb[0].mxu1 %v313_v21 }
 0x1d9   : > { %v419_v24 = vpop.f32.mrb[0].mxu1 }
 0x1da   : > { %v608_v25 = vpop.f32.mrb[1].mxu1  ;;  %v420_v27 = vadd.f32 %v528_v23, %v419_v24 }
 0x1db   : > { %v422_v26 = vpop.f32.mrb[2].mxu1 }
 0x1dc   : > { %v423_v28 = vadd.f32 %v528_v23, %v422_v26  ;;  %v609_v29 = vpop.f32.mrb[3].mxu1 }
 0x1de   : > { %v550_v30 = vpack.c.bf16 %v423_v28, %v420_v27 }
 0x1e0   : > { %551 = vst [vmem:[%s191_s8] sm:$0xff] %v550_v30  }
 0x1e1   : > { %683 = shalt.err (!%p680_p3)
}
 0x1e2   : > { %s684_s28 = scalar_lea.hbm %s877_s14, 128  ;;  %s688_s11 = scalar_lea.hbm %s924_s4, 256 }
 0x1e3   : > { %p685_p4 = scmp.ne.s32.totalorder %s877_s14, %s684_s28  ;;  %p689_p9 = scmp.lt.u32.totalorder %s877_s14, %s924_s4 }
 0x1e4   : > { %p690_p10 = scmp.lt.u32.totalorder %s688_s11, %s684_s28  ;;  %p692_p12 = scmp.lt.u32.totalorder %s684_s28, %s877_s14 }
 0x1e5   : > { %p686_p7 = pnand %p685_p4, %p802_p5 }
 0x1e6   : > { %p691_p11 = por %p690_p10, %p689_p9 }
 0x1e7   : > { %p687_p8 = pneg %p686_p7 }
 0x1e8   : > { %p693_p13 = por %p692_p12, %p691_p11 }
 0x1ea   : > { %p694_p0 = pnand %p693_p13, %p687_p8 }
 0x1ec   : > { %697 = shalt.err (!%p694_p0)
}
 0x1ed   : > { %s737_s7 = smov 64   ;;  %s738_s8 = smov 4  }
 0x1ee   : > { %610 = dma.vmem_to_hbm [thread:$0]  (%p802_p5), %s872_s9, 128, %s877_s14, %s879_s20, %s737_s7, %s737_s7, %s738_s8  }
 0x1ef PF: > { %p616_p1 = scmp.ge.s32.totalorder %s732_s18, 2  ;;  %s465_s10 = sand.u32 1, %s720_s15  }
 0x1f0   : > { %s466_s12 = scalar_lea.sflag [#allocation3], %s465_s10 }
 0x1f1   : > { %p613_p2 = pnand %p616_p1, %p806_p6 }
 0x1f3   : > { %715 = dma.done.wait (!%p613_p2), %s466_s12, 128  }
 0x1f4   : > { %717 = vsyncadd (!%p613_p2), %s466_s12, 4294967168  ;;  %p14_p3 = scmp.ge.s32.totalorder %s789_s21, 4   ;;  %s927_s15 = smov %s724_s16 }
 0x1f5   : > { %s928_s16 = smov %s728_s17  ;;  %s929_s17 = smov %s800_s24 }
 0x1f6   : > { %s930_s18 = smov %s789_s21  ;;  %16 = sbr.rel (!%p14_p3) target bundleno = 3 (0x3), region = 71 }
 0x1fd   :  { %471 = vsyncpa [#allocation3], 1 }
 0x1fe   :  { %473 = vsyncpa [#allocation3 + $0x1], 1 }

</bundles_post_ra>
